<compile_context>
chip_gen: v7x
topology: tpu7x:2x2x1
jax: 0.10.0
libtpu: 0.0.40
codegen_flags: <defaults>
</compile_context>

<pallas_src>
import jax
import jax.numpy as jnp
from jax.experimental import pallas as pl
from jax.experimental.pallas import tpu as pltpu

EPS = 1e-5  # nn.BatchNorm1d default eps
_VMEM_LIMIT = 32 * 1024 * 1024  # safe on v5e/v6e/v7x; way above what we use


def _stats_kernel(w_ref, x_ref, sum_ref, sq_ref):
    # w_ref: (Cout, Cin), x_ref: (Cin, TL), sum_ref/sq_ref: (Cout, 1) accumulators
    @pl.when((pl.program_id(0) == 0) & (pl.program_id(1) == 0))
    def _init():
        sum_ref[...] = jnp.zeros_like(sum_ref)
        sq_ref[...] = jnp.zeros_like(sq_ref)

    y = jnp.dot(w_ref[...], x_ref[...], preferred_element_type=jnp.float32)  # (Cout, TL)
    sum_ref[...] += jnp.sum(y, axis=1, keepdims=True)
    sq_ref[...] += jnp.sum(y * y, axis=1, keepdims=True)


def _bn_silu_kernel(w_ref, scale_ref, shift_ref, x_ref, o_ref):
    # w_ref: (Cout, Cin), scale/shift: (Cout, 1), x_ref: (Cin, TL), o_ref: (Cout, TL)
    y = jnp.dot(w_ref[...], x_ref[...], preferred_element_type=jnp.float32)
    z = y * scale_ref[...] + shift_ref[...]          # folded BN, lane-broadcast
    o_ref[...] = (z * jax.nn.sigmoid(z)).astype(o_ref.dtype)  # SiLU (EUP sigmoid)


def _pick_tile(L):
    """Largest multiple-of-128 tile (<= 8192) that divides L, else whole L."""
    if L % 128 != 0:
        return L
    for tl in (8192, 4096, 2048, 1024, 512, 256, 128):
        if L % tl == 0:
            return tl
    return L


def conv1x1_forward(x, weight, gamma, beta):
    """x: (N, Cin, L); weight: (Cout, Cin, 1); gamma/beta: (Cout,). Returns (N, Cout, L)."""
    N, Cin, L = x.shape
    Cout = weight.shape[0]
    TL = _pick_tile(L)
    n_l = L // TL
    M = N * L

    x = x.astype(jnp.float32)
    w2d = weight[:, :, 0].astype(jnp.float32)  # (Cout, Cin) — no transpose needed

    x_spec = pl.BlockSpec((None, Cin, TL), lambda n, l: (n, 0, l))
    w_spec = pl.BlockSpec((Cout, Cin), lambda n, l: (0, 0))
    stat_spec = pl.BlockSpec((Cout, 1), lambda n, l: (0, 0))

    # ---- pass 1: per-channel sum / sum-of-squares over all (n, l) positions ----
    s, sq = pl.pallas_call(
        _stats_kernel,
        out_shape=(jax.ShapeDtypeStruct((Cout, 1), jnp.float32),
                   jax.ShapeDtypeStruct((Cout, 1), jnp.float32)),
        grid_spec=pltpu.PrefetchScalarGridSpec(
            num_scalar_prefetch=0,
            grid=(N, n_l),
            in_specs=[w_spec, x_spec],
            out_specs=(stat_spec, stat_spec),
        ),
        compiler_params=pltpu.CompilerParams(
            dimension_semantics=("arbitrary", "arbitrary"),
            vmem_limit_bytes=_VMEM_LIMIT,
        ),
    )(w2d, x)

    # ---- fold BN (training-mode, biased variance) into per-channel scale/shift ----
    mean = s / M
    var = jnp.maximum(sq / M - mean * mean, 0.0)
    scale = gamma.reshape(Cout, 1).astype(jnp.float32) * jax.lax.rsqrt(var + EPS)
    shift = beta.reshape(Cout, 1).astype(jnp.float32) - mean * scale

    # ---- pass 2: matmul + fused BN + SiLU, megacore-parallel, NCL output ----
    out = pl.pallas_call(
        _bn_silu_kernel,
        out_shape=jax.ShapeDtypeStruct((N, Cout, L), jnp.float32),
        grid_spec=pltpu.PrefetchScalarGridSpec(
            num_scalar_prefetch=0,
            grid=(N, n_l),
            in_specs=[w_spec, stat_spec, stat_spec, x_spec],
            out_specs=pl.BlockSpec((None, Cout, TL), lambda n, l: (n, 0, l)),
        ),
        compiler_params=pltpu.CompilerParams(
            dimension_semantics=("parallel", "parallel"),
            vmem_limit_bytes=_VMEM_LIMIT,
        ),
    )(w2d, scale, shift, x)

    return out


def conv1x1_reference(x, weight, gamma, beta):
    """Pure-JAX reference matching the PyTorch forward (training-mode BN)."""
    y = jnp.einsum("ncl,oc->nol", x, weight[:, :, 0])
    mean = jnp.mean(y, axis=(0, 2), keepdims=True)
    var = jnp.mean((y - mean) ** 2, axis=(0, 2), keepdims=True)
    xhat = (y - mean) / jnp.sqrt(var + EPS)
    z = xhat * gamma[None, :, None] + beta[None, :, None]
    return z * jax.nn.sigmoid(z)


if __name__ == "__main__":
    # Small shapes consistent with Conv1x1: batch=2, in_channels=8,
    # out_channels=16, sequence length=384 (=> 3 lane-aligned tiles of 128,
    # exercising the cross-tile BN statistics path).
    N, Cin, Cout, L = 2, 8, 16, 384

    key = jax.random.PRNGKey(0)
    kx, kw = jax.random.split(key)
    x = jax.random.normal(kx, (N, Cin, L), dtype=jnp.float32)
    # Conv1d weight shape: (out_channels, in_channels/groups, kernel_size=1)
    weight = jax.random.normal(kw, (Cout, Cin, 1), dtype=jnp.float32) * 0.1
    # BatchNorm1d default init (deterministic): weight=1, bias=0.
    gamma = jnp.ones((Cout,), dtype=jnp.float32)
    beta = jnp.zeros((Cout,), dtype=jnp.float32)

    out = conv1x1_forward(x, weight, gamma, beta)
    out = jax.block_until_ready(out)

    ref = conv1x1_reference(x, weight, gamma, beta)
    assert out.shape == (N, Cout, L), out.shape
    assert jnp.allclose(out, ref, rtol=1e-4, atol=1e-5), "mismatch vs reference"

    print("KERNEL_OK")
</pallas_src>

<mosaic_0001>
module attributes {stable_mosaic.version = 11 : i64} {
  func.func @_stats_kernel(%arg0: i32, %arg1: i32, %arg2: memref<16x8xf32, #tpu.memory_space<vmem>>, %arg3: memref<1x8x128xf32, #tpu.memory_space<vmem>>, %arg4: memref<16x1xf32, #tpu.memory_space<vmem>>, %arg5: memref<16x1xf32, #tpu.memory_space<vmem>>) attributes {dimension_semantics = [#tpu.dimension_semantics<arbitrary>, #tpu.dimension_semantics<arbitrary>], iteration_bounds = array<i64: 2, 3>, scalar_prefetch = 0 : i64, scratch_operands = 0 : i64, tpu.core_type = #tpu.core_type<tc>, window_params = [{pipeline_mode = #tpu.pipeline_mode<synchronous>, transform_indices = @transform_0, window_bounds = array<i64: 16, 8>}, {transform_indices = @transform_1, window_bounds = array<i64: 1, 8, 128>}, {pipeline_mode = #tpu.pipeline_mode<synchronous>, transform_indices = @transform_2, window_bounds = array<i64: 16, 1>}, {pipeline_mode = #tpu.pipeline_mode<synchronous>, transform_indices = @transform_3, window_bounds = array<i64: 16, 1>}]} {
    %c0_i32 = arith.constant 0 : i32
    %0 = arith.cmpi eq, %arg0, %c0_i32 : i32
    %c0_i32_0 = arith.constant 0 : i32
    %1 = arith.cmpi eq, %arg1, %c0_i32_0 : i32
    %2 = arith.andi %0, %1 : i1
    %3 = arith.extui %2 : i1 to i32
    %c0_i32_1 = arith.constant 0 : i32
    %4 = arith.cmpi ne, %3, %c0_i32_1 : i32
    scf.if %4 {
      %cst_16 = arith.constant 0.000000e+00 : f32
      %20 = vector.broadcast %cst_16 : f32 to vector<16x1xf32>
      %c0_17 = arith.constant 0 : index
      %c0_18 = arith.constant 0 : index
      %21 = vector.load %arg4[%c0_17, %c0_18] : memref<16x1xf32, #tpu.memory_space<vmem>>, vector<16x1xf32>
      tpu.vector_store %arg4[%c0_17, %c0_18], %20 {strides = array<i32>} : memref<16x1xf32, #tpu.memory_space<vmem>>, vector<16x1xf32>,
      %cst_19 = arith.constant 0.000000e+00 : f32
      %22 = vector.broadcast %cst_19 : f32 to vector<16x1xf32>
      %c0_20 = arith.constant 0 : index
      %c0_21 = arith.constant 0 : index
      %23 = vector.load %arg5[%c0_20, %c0_21] : memref<16x1xf32, #tpu.memory_space<vmem>>, vector<16x1xf32>
      tpu.vector_store %arg5[%c0_20, %c0_21], %22 {strides = array<i32>} : memref<16x1xf32, #tpu.memory_space<vmem>>, vector<16x1xf32>,
    } else {
    }
    %c0 = arith.constant 0 : index
    %c0_2 = arith.constant 0 : index
    %5 = vector.load %arg2[%c0, %c0_2] : memref<16x8xf32, #tpu.memory_space<vmem>>, vector<16x8xf32>
    %c0_3 = arith.constant 0 : index
    %c0_4 = arith.constant 0 : index
    %c0_5 = arith.constant 0 : index
    %6 = vector.load %arg3[%c0_3, %c0_4, %c0_5] : memref<1x8x128xf32, #tpu.memory_space<vmem>>, vector<1x8x128xf32>
    %7 = vector.shape_cast %6 : vector<1x8x128xf32> to vector<8x128xf32>
    %cst = arith.constant dense<0.000000e+00> : vector<16x128xf32>
    %8 = tpu.matmul %5, %7, %cst {dimension_numbers = #tpu.dot_dimension_numbers<[1], [0], [0], [1], [0, 0, 1, 1], [], []>} : vector<16x8xf32>, vector<8x128xf32>, vector<16x128xf32> -> vector<16x128xf32>
    %c0_6 = arith.constant 0 : index
    %c0_7 = arith.constant 0 : index
    %9 = vector.load %arg4[%c0_6, %c0_7] : memref<16x1xf32, #tpu.memory_space<vmem>>, vector<16x1xf32>
    %cst_8 = arith.constant dense<0.000000e+00> : vector<16xf32>
    %10 = vector.multi_reduction <add>, %8, %cst_8 [1] : vector<16x128xf32> to vector<16xf32>
    %11 = vector.shape_cast %10 : vector<16xf32> to vector<16x1xf32>
    %12 = arith.addf %9, %11 : vector<16x1xf32>
    %c0_9 = arith.constant 0 : index
    %c0_10 = arith.constant 0 : index
    %13 = vector.load %arg4[%c0_9, %c0_10] : memref<16x1xf32, #tpu.memory_space<vmem>>, vector<16x1xf32>
    tpu.vector_store %arg4[%c0_9, %c0_10], %12 {strides = array<i32>} : memref<16x1xf32, #tpu.memory_space<vmem>>, vector<16x1xf32>,
    %c0_11 = arith.constant 0 : index
    %c0_12 = arith.constant 0 : index
    %14 = vector.load %arg5[%c0_11, %c0_12] : memref<16x1xf32, #tpu.memory_space<vmem>>, vector<16x1xf32>
    %15 = arith.mulf %8, %8 : vector<16x128xf32>
    %cst_13 = arith.constant dense<0.000000e+00> : vector<16xf32>
    %16 = vector.multi_reduction <add>, %15, %cst_13 [1] : vector<16x128xf32> to vector<16xf32>
    %17 = vector.shape_cast %16 : vector<16xf32> to vector<16x1xf32>
    %18 = arith.addf %14, %17 : vector<16x1xf32>
    %c0_14 = arith.constant 0 : index
    %c0_15 = arith.constant 0 : index
    %19 = vector.load %arg5[%c0_14, %c0_15] : memref<16x1xf32, #tpu.memory_space<vmem>>, vector<16x1xf32>
    tpu.vector_store %arg5[%c0_14, %c0_15], %18 {strides = array<i32>} : memref<16x1xf32, #tpu.memory_space<vmem>>, vector<16x1xf32>,
    return
  }
  func.func @transform_0(%arg0: i32, %arg1: i32) -> (i32, i32) {
    %c0_i32 = arith.constant 0 : i32
    %c0_i32_0 = arith.constant 0 : i32
    %c0_i32_1 = arith.constant 0 : i32
    return %c0_i32, %c0_i32_0 : i32, i32
  }
  func.func @transform_1(%arg0: i32, %arg1: i32) -> (i32, i32, i32) {
    %c0_i32 = arith.constant 0 : i32
    %c0_i32_0 = arith.constant 0 : i32
    return %arg0, %c0_i32, %arg1 : i32, i32, i32
  }
  func.func @transform_2(%arg0: i32, %arg1: i32) -> (i32, i32) {
    %c0_i32 = arith.constant 0 : i32
    %c0_i32_0 = arith.constant 0 : i32
    %c0_i32_1 = arith.constant 0 : i32
    return %c0_i32, %c0_i32_0 : i32, i32
  }
  func.func @transform_3(%arg0: i32, %arg1: i32) -> (i32, i32) {
    %c0_i32 = arith.constant 0 : i32
    %c0_i32_0 = arith.constant 0 : i32
    %c0_i32_1 = arith.constant 0 : i32
    return %c0_i32, %c0_i32_0 : i32, i32
  }
}

</mosaic_0001>

<bundles_post_ra>
// kernel: tpu_custom_call.1
= control target key start
LH: loop header
LB: loop body
LE: loop exit
PB: predicated region body
PF: predicated region fallthrough
CT: control target
= control target key end

     0   :  { %9 = vsyncpa [#allocation3], 0  ;;  %s766_s0 = inlined_call_operand.vmem [shape: f32[16,8], index: 0, kind: input, shape index: {}]   ;;  %s767_s1 = inlined_call_operand.hbm [shape: f32[2,8,384], index: 1, kind: input, shape index: {}]   ;;  %s768_s2 = inlined_call_operand.vmem [shape: f32[16,1], index: 2, kind: output, shape index: {0}]   ;;  %s769_s3 = inlined_call_operand.vmem [shape: f32[16,1], index: 3, kind: output, shape index: {1}]  }
   0x1   :  { %11 = vsyncpa [#allocation3 + $0x1], 0  ;;  %s577_s12 = smov 0   ;;  %s579_s13 = smov 0  }
   0x2   :  { %s581_s14 = smov 0   ;;  %s583_s15 = smov 0  }
   0x3   :  { %s585_s16 = smov 0   ;;  %s587_s17 = smov 0  }
   0x4   :  { %s589_s18 = smov 0   ;;  %s591_s19 = smov 0  }
   0x5 LB: > { %s365_s20 = sadd.s32 4294967295, %s553_s19   ;;  %s26_s21 = sadd.s32 1, %s545_s17  ;;  %s553_s19 = sphi %s591_s19, %s17_s19   ;;  %s549_s18 = sphi %s589_s18, %s781_s18   ;;  %s545_s17 = sphi %s587_s17, %s780_s17   ;;  %s541_s16 = sphi %s585_s16, %s779_s16   ;;  %s537_s15 = sphi %s583_s15, %s778_s15   ;;  %s533_s14 = sphi %s581_s14, %s777_s14   ;;  %s529_s13 = sphi %s579_s13, %s776_s13   ;;  %s525_s12 = sphi %s577_s12, %s775_s12  }
   0x6   : > { %p27_p0 = scmp.ge.s32.totalorder %s26_s21, 3  ;;  %s29_s22 = sadd.s32 1, %s549_s18 }
   0x7   : > { %s59_s23 = sadd.s32 1, %s533_s14  ;;  %p66_p1 = scmp.ne.s32.totalorder %s533_s14, %s529_s13 }
   0x8   : > { %s783_s21 = smov (%p27_p0, %s26_s21), 0  ;;  %s785_s22 = smov (!%p27_p0, %s29_s22), %s549_s18 }
   0x9   : > { %s55_s24 = ssub.s32 %s545_s17, %s783_s21  ;;  %p67_p2 = scmp.eq.s32.totalorder %s553_s19, 0 }
   0xa   : > { %p31_p3 = scmp.ge.s32.totalorder %s785_s22, 2  ;;  %p72_p4 = scmp.ne.s32.totalorder %s529_s13, %s525_s12 }
   0xb   : > { %p628_p5 = por %p67_p2, %p66_p1  ;;  %p73_p6 = scmp.eq.s32.totalorder %s365_s20, 0 }
   0xc   : > { %s787_s22 = smov (%p31_p3, %s785_s22), 0  ;;  %p391_p8 = scmp.lt.s32.totalorder %s553_s19, 6 }
   0xd   : > { %p634_p7 = por %p73_p6, %p72_p4  ;;  %s54_s27 = ssub.s32 %s549_s18, %s787_s22 }
   0xe   : > { %s56_s28 = sor.u32 %s55_s24, %s54_s27  ;;  %s141_s29 = sand.u32 1, %s533_s14  }
   0xf   : > { %p57_p9 = scmp.eq.s32.totalorder %s56_s28, 0  ;;  %s368_s30 = sshll.u32 %s141_s29, 3 }
  0x10   : > { %s384_s4 = smul.u32 3, %s549_s18  ;;  %s145_s8 = scalar_lea.vmem [#allocation2], %s368_s30 }
  0x11   : > { %s644_s5 = scalar_select %p57_p9, %s533_s14, %s59_s23  }
  0x12   : > { %s150_s6 = sadd.s32 %s545_s17, %s384_s4  ;;  %s154_s9 = sshll.u32 %s145_s8, 4  ;;  %s652_s9 = int_to_ptr.vmem [resolvable:$true] %s154_s9 }
  0x13   : > { %s369_s7 = sshll.u32 %s150_s6, 7  ;;  %p658_p10 = pnand %p391_p8, %p628_p5 }
  0x14   : > { %s650_s12 = scalar_lea.hbm %s767_s1, %s369_s7  ;;  %s142_s23 = scalar_lea.sflag [#allocation3], %s141_s29 }
  0x15   : > { %s457_s24 = scalar_lea.hbm %s650_s12, 128  ;;  %p459_p0 = pneg %p658_p10 }
  0x16   : > { %p458_p13 = scmp.ne.s32.totalorder %s650_s12, %s457_s24  ;;  %s462_s28 = scalar_lea.hbm %s767_s1, 768 }
  0x17   : > { %p463_p3 = scmp.lt.u32.totalorder %s650_s12, %s767_s1  ;;  %p464_p4 = scmp.lt.u32.totalorder %s462_s28, %s457_s24 }
  0x18   : > { %p460_p1 = pnand %p459_p0, %p458_p13  ;;  %p466_p6 = scmp.lt.u32.totalorder %s457_s24, %s650_s12 }
  0x19   : > { %p465_p5 = por %p464_p4, %p463_p3 }
  0x1a   : > { %p461_p2 = pneg %p460_p1 }
  0x1b   : > { %p467_p8 = por %p466_p6, %p465_p5 }
  0x1d   : > { %p468_p9 = pnand %p467_p8, %p461_p2 }
  0x1f   : > { %471 = shalt.err (!%p468_p9)
}
  0x20   : > { %s472_s29 = scalar_lea.vmem %s652_s9, 128  ;;  %s555_s6 = smov [#allocation2]  }
  0x21   : > { %p473_p13 = scmp.ne.s32.totalorder %s652_s9, %s472_s29  ;;  %s477_s7 = sshll.u32 %s555_s6, 4  ;;  %s478_s7 = int_to_ptr.vmem [resolvable:$false] %s477_s7 }
  0x22   : > { %s479_s8 = scalar_lea.vmem %s478_s7, 256  ;;  %p480_p12 = scmp.lt.s32.totalorder %s652_s9, %s478_s7 }
  0x23   : > { %p475_p1 = pnand %p473_p13, %p459_p0  ;;  %p481_p3 = scmp.lt.s32.totalorder %s479_s8, %s472_s29 }
  0x25   : > { %p476_p11 = pneg %p475_p1  ;;  %p482_p4 = por %p481_p3, %p480_p12 }
  0x27   : > { %p483_p5 = pnand %p482_p4, %p476_p11 }
  0x29   : > { %486 = shalt.err (!%p483_p5)
}
  0x2a   : > { %390 = dma.hbm_to_vmem [thread:$0]  (!%p658_p10), %s650_s12, 128, %s652_s9, %s142_s23  }
  0x2b   : > { %p773_p2 = scmp.lt.s32.totalorder %s553_s19, 7  ;;  %p774_p6 = scmp.ge.s32.totalorder %s553_s19, 1 }
  0x2d   : > { %p160_p0 = pnand %p774_p6, %p773_p2 }
  0x2e   : > { %s165_s10 = sand.u32 (!%p160_p0), 1, %s529_s13  }
  0x2f   : > { %163 = sbr.rel (%p160_p0) target bundleno = 433 (0x1b1), region = 28  ;;  %s371_s11 = sshll.u32 (!%p160_p0), %s165_s10, 3 }
  0x30   : > { %s166_s24 = scalar_lea.sflag (!%p160_p0), [#allocation3], %s165_s10  ;;  %s169_s27 = scalar_lea.vmem (!%p160_p0), [#allocation2], %s371_s11 }
  0x36   : > { %520 = dma.done.wait (%p634_p7), %s166_s24, 128  }
  0x37   : > { %522 = vsyncadd (%p634_p7), %s166_s24, 4294967168  ;;  %p187_p11 = scmp.eq.s32.totalorder %s541_s16, 0  ;;  %p188_p12 = scmp.eq.s32.totalorder %s537_s15, 0 }
  0x39   : > { %p189_p10 = pnand %p188_p12, %p187_p11 }
  0x3a   : > { %vm193_vm0 = vcmask (!%p189_p10), 7168   ;;  %v556_v0 = vmov (!%p189_p10), 0.0  }
  0x3b   : > { %192 = sbr.rel (%p189_p10) target bundleno = 66 (0x42), region = 36  ;;  %194 = vst.msk [vmem:[%s768_s2] sm:$0xff] (!%p189_p10), %vm193_vm0, %v556_v0  ;;  %195 = vst.msk [vmem:[%s768_s2 + $0x8] sm:$0xff] (!%p189_p10), %vm193_vm0, %v556_v0 }
  0x3c   : > { %196 = vst.msk [vmem:[%s769_s3] sm:$0xff] (!%p189_p10), %vm193_vm0, %v556_v0  ;;  %197 = vst.msk [vmem:[%s769_s3 + $0x8] sm:$0xff] (!%p189_p10), %vm193_vm0, %v556_v0 }
  0x42 PF: > { %v200_v1 = vld [vmem:[%s169_s27] sm:$0xff]  ;;  %vm201_vm1 = vcmask 64512   ;;  %vm291_vm2 = vcmask 7168  }
  0x43   : > { %v198_v2 = vld [vmem:[%s766_s0] sm:$0xff]  ;;  %v199_v3 = vld [vmem:[%s766_s0 + $0x8] sm:$0xff]  ;;  %379 = vmatprep.subr.mxu0 %v200_v1 }
  0x44   : > { %381 = vmatprep.mubr.msk.f32.mxu0 %vm201_vm1, %v198_v2  ;;  %380 = vmatpush3.msra.mxu0 %v200_v1  ;;  %v283_v8 = vld [vmem:[%s768_s2] sm:$0xff]  ;;  %v284_v13 = vld [vmem:[%s768_s2 + $0x8] sm:$0xff] }
  0x45   : > { %382 = vmatmul.mubr.msk.f32.vlgmr.msra.gmra.mrb[0].mxu0 %vm201_vm1, %v199_v3  ;;  %v294_v10 = vld [vmem:[%s769_s3] sm:$0xff]  ;;  %v295_v16 = vld [vmem:[%s769_s3 + $0x8] sm:$0xff] }
 0x118   : > { %v383_v4 = vpop.f32.mrb[0].mxu0 }
 0x119   : > { %v274_v5 = vpop.f32.mrb[1].mxu0  ;;  %v297_v7 = vmul.f32 %v383_v4, %v383_v4 }
 0x11a   : > { %285 = vadd.xlane.f32.xlu0 %v274_v5  ;;  %v296_v6 = vmul.f32 %v274_v5, %v274_v5 }
 0x11c   : > { %298 = vadd.xlane.f32.xlu1 %v296_v6 }
 0x11e   : > { %287 = vadd.xlane.f32.xlu0 %v383_v4 }
 0x120   : > { %300 = vadd.xlane.f32.xlu1 %v297_v7 }
 0x1a7   : > { %v286_v9 = vpop.xlane.xlu0 %285 }
 0x1a8   : > { %v289_v11 = vadd.f32 %v286_v9, %v283_v8 }
 0x1a9   : > { %v299_v12 = vpop.xlane.xlu1 %298 }
 0x1aa   : > { %292 = vst.msk [vmem:[%s768_s2] sm:$0xff] %vm291_vm2, %v289_v11  ;;  %v302_v14 = vadd.f32 %v299_v12, %v294_v10 }
 0x1ab   : > { %v288_v15 = vpop.xlane.xlu0 %287 }
 0x1ac   : > { %304 = vst.msk [vmem:[%s769_s3] sm:$0xff] %vm291_vm2, %v302_v14  ;;  %v290_v17 = vadd.f32 %v288_v15, %v284_v13 }
 0x1ad   : > { %v301_v18 = vpop.xlane.xlu1 %300 }
 0x1ae   : > { %293 = vst.msk [vmem:[%s768_s2 + $0x8] sm:$0xff] %vm291_vm2, %v290_v17  ;;  %v303_v19 = vadd.f32 %v301_v18, %v295_v16 }
 0x1b0   : > { %305 = vst.msk [vmem:[%s769_s3 + $0x8] sm:$0xff] %vm291_vm2, %v303_v19 }
 0x1b1 PF: > { %s17_s19 = sadd.s32 1, %s553_s19   ;;  %s775_s12 = smov %s529_s13 }
 0x1b2   : > { %p14_p7 = scmp.ge.s32.totalorder %s17_s19, 8   ;;  %s776_s13 = smov %s533_s14 }
 0x1b3   : > { %s777_s14 = smov %s644_s5  ;;  %s778_s15 = smov %s545_s17 }
 0x1b4   : > { %s779_s16 = smov %s549_s18  ;;  %s780_s17 = smov %s783_s21 }
 0x1b5   : > { %s781_s18 = smov %s787_s22  ;;  %16 = sbr.rel (!%p14_p7) target bundleno = 5 (0x5), region = 76 }
 0x1bc   :  { %323 = vsyncpa [#allocation3], 1 }
 0x1bd   :  { %325 = vsyncpa [#allocation3 + $0x1], 1 }

</bundles_post_ra>
